<compile_context>
chip_gen: v5e
topology: v5e:2x2
jax: 0.10.0
libtpu: 0.0.40
codegen_flags: <defaults>
</compile_context>

<pallas_src>
import jax
import jax.numpy as jnp
from jax.experimental import pallas as pl
from jax.experimental.pallas import tpu as pltpu


def _round_up(n, m):
    return (n + m - 1) // m * m


# --------------------- Stage 1: lnet (shared MLP) + max-pool ------------------

def lnet_pool_kernel(x_ref, w1_ref, b1_ref, w2_ref, b2_ref, o_ref):
    """grid = (batch, n_point_tiles).  Channels-first: x tile is (cin_p, tn).
    The pooled channel-max is accumulated directly in the resident output
    block (1, c2_p, 1); the first points tile writes its max directly."""
    nt = pl.program_id(1)

    xT = x_ref[0]                                            # (cin_p, tn) bf16
    h = jnp.dot(w1_ref[...], xT, preferred_element_type=jnp.float32)
    h = jnp.maximum(h + b1_ref[...], 0.0)                    # (c1_p, tn) f32
    h = jnp.dot(w2_ref[...], h.astype(jnp.bfloat16),
                preferred_element_type=jnp.float32)
    h = jnp.maximum(h + b2_ref[...], 0.0)                    # (c2_p, tn) f32

    m = jnp.max(h, axis=1, keepdims=True)                    # (c2_p, 1) lane reduce

    @pl.when(nt == 0)
    def _first():
        o_ref[0] = m

    @pl.when(nt != 0)
    def _rest():
        o_ref[0] = jnp.maximum(o_ref[0], m)


# ------------------ Stage 2: gnet FC stack + final fc, batched ----------------

def gnet_tail_kernel(g_ref, w3_ref, b3_ref, w4_ref, b4_ref, wf_ref, bf_ref,
                     o_ref):
    g = g_ref[...].astype(jnp.bfloat16)                      # (B_p, c2_p)
    h = jnp.dot(g, w3_ref[...], preferred_element_type=jnp.float32)
    h = jnp.maximum(h + b3_ref[...], 0.0)                    # (B_p, c3_p)
    h = jnp.dot(h.astype(jnp.bfloat16), w4_ref[...],
                preferred_element_type=jnp.float32)
    h = jnp.maximum(h + b4_ref[...], 0.0)                    # (B_p, c4_p)
    h = jnp.dot(h.astype(jnp.bfloat16), wf_ref[...],
                preferred_element_type=jnp.float32)
    o_ref[...] = h + bf_ref[...]                             # (B_p, mm_p)


# --------------------------------- wrapper ------------------------------------

def tnet_forward(x, params, matrix_size, *, tile_n=2048):
    (w1, s1, b1), (w2, s2, b2), (w3, s3, b3), (w4, s4, b4), (wf, bf) = params
    B, N, cin = x.shape
    LANE = 128
    cin_p = _round_up(cin, 16)                 # bf16-friendly sublane pad
    c1, c2, c3, c4 = w1.shape[0], w2.shape[0], w3.shape[0], w4.shape[0]
    mm = wf.shape[0]
    c1_p, c2_p, c3_p, c4_p, mm_p = (_round_up(c, LANE)
                                    for c in (c1, c2, c3, c4, mm))

    # ---- points tiling: one tile per batch whenever it fits the cap ----------
    tile_n = max(LANE, (tile_n // LANE) * LANE)
    n_pad128 = _round_up(N, LANE)
    if n_pad128 <= tile_n:
        tn, n_pad = n_pad128, n_pad128
    else:
        tn = tile_n
        n_pad = _round_up(N, tn)
    n_tiles = n_pad // tn

    # edge-pad points (duplicates don't change the max; safe only because ReLU
    # precedes the pool), zero-pad channels, go channels-first, cast bf16.
    xp = jnp.pad(x, ((0, 0), (0, n_pad - N), (0, 0)), mode="edge")
    xp = jnp.pad(xp, ((0, 0), (0, 0), (0, cin_p - cin)))
    xp = jnp.transpose(xp, (0, 2, 1)).astype(jnp.bfloat16)   # (B, cin_p, n_pad)

    # ---- fold eval-mode BN scale into weights at trace time ------------------
    def prep_w_oi(w, s, out_p, in_p):          # keep (out, in) for stage 1
        wm = w * s.reshape(-1, 1)
        wm = jnp.pad(wm, ((0, out_p - wm.shape[0]), (0, in_p - wm.shape[1])))
        return wm.astype(jnp.bfloat16)

    def prep_w_io(w, s, in_p, out_p):          # pre-transpose (in, out), stage 2
        wt = w.T * s
        wt = jnp.pad(wt, ((0, in_p - wt.shape[0]), (0, out_p - wt.shape[1])))
        return wt.astype(jnp.bfloat16)

    def prep_b_col(b, out_p):                  # (c, 1) column bias (channels-first)
        bc = b.reshape(-1, 1)
        return jnp.pad(bc, ((0, out_p - bc.shape[0]), (0, 0))).astype(jnp.float32)

    def prep_b_row(b, out_p):                  # (1, c) row bias
        br = b.reshape(1, -1)
        return jnp.pad(br, ((0, 0), (0, out_p - br.shape[1]))).astype(jnp.float32)

    w1p = prep_w_oi(w1, s1, c1_p, cin_p); b1p = prep_b_col(b1, c1_p)
    w2p = prep_w_oi(w2, s2, c2_p, c1_p);  b2p = prep_b_col(b2, c2_p)
    w3p = prep_w_io(w3, s3, c2_p, c3_p);  b3p = prep_b_row(b3, c3_p)
    w4p = prep_w_io(w4, s4, c3_p, c4_p);  b4p = prep_b_row(b4, c4_p)
    wfp = jnp.pad(wf.T, ((0, c4_p - c4), (0, mm_p - mm))).astype(jnp.bfloat16)
    bfp = prep_b_row(bf, mm_p)

    const2 = lambda b, n: (0, 0)
    pooled = pl.pallas_call(
        lnet_pool_kernel,
        out_shape=jax.ShapeDtypeStruct((B, c2_p, 1), jnp.float32),
        grid=(B, n_tiles),
        in_specs=[
            pl.BlockSpec((1, cin_p, tn), lambda b, n: (b, 0, n)),
            pl.BlockSpec((c1_p, cin_p), const2), pl.BlockSpec((c1_p, 1), const2),
            pl.BlockSpec((c2_p, c1_p), const2),  pl.BlockSpec((c2_p, 1), const2),
        ],
        out_specs=pl.BlockSpec((1, c2_p, 1), lambda b, n: (b, 0, 0)),
        compiler_params=pltpu.CompilerParams(
            dimension_semantics=("parallel", "arbitrary")),
    )(xp, w1p, b1p, w2p, b2p)

    # ---- stage 2: batched gnet tail (one MXU chain for all batches) ----------
    B_p = _round_up(B, 8)
    g = jnp.pad(pooled[:, :, 0], ((0, B_p - B), (0, 0)))     # (B_p, c2_p) f32

    def whole(shape):
        nd = len(shape)
        return pl.BlockSpec(shape, lambda i, _nd=nd: (0,) * _nd)

    tail_inputs = (g, w3p, b3p, w4p, b4p, wfp, bfp)
    out = pl.pallas_call(
        gnet_tail_kernel,
        out_shape=jax.ShapeDtypeStruct((B_p, mm_p), jnp.float32),
        grid=(1,),
        in_specs=[whole(tuple(a.shape)) for a in tail_inputs],
        out_specs=whole((B_p, mm_p)),
        compiler_params=pltpu.CompilerParams(
            dimension_semantics=("arbitrary",)),
    )(*tail_inputs)

    return out[:B, :mm].reshape(B, matrix_size, matrix_size)


# ----------------------- deterministic parameter init ------------------------

def _folded_bn(key, c):
    """Fold eval-mode BatchNorm1d into per-channel scale/shift, shape (1, c)."""
    kg, kb, km, kv = jax.random.split(key, 4)
    gamma = jax.random.uniform(kg, (c,), jnp.float32, 0.5, 1.5)
    beta = 0.1 * jax.random.normal(kb, (c,), jnp.float32)
    mean = 0.1 * jax.random.normal(km, (c,), jnp.float32)
    var = jax.random.uniform(kv, (c,), jnp.float32, 0.5, 1.5)
    eps = 1e-5
    scale = gamma / jnp.sqrt(var + eps)
    shift = beta - mean * scale
    return scale.reshape(1, c), shift.reshape(1, c)


def init_params(key, cin, lnet_dims, gnet_dims, matrix_size):
    dims = [cin] + lnet_dims + gnet_dims
    params = []
    for i in range(len(dims) - 1):
        key, kw, kbn = jax.random.split(key, 3)
        w = 0.1 * jax.random.normal(kw, (dims[i + 1], dims[i]), jnp.float32)
        s, b = _folded_bn(kbn, dims[i + 1])
        params.append((w, s, b))
    key, kw, kb = jax.random.split(key, 3)
    mm = matrix_size ** 2
    wf = 0.1 * jax.random.normal(kw, (mm, gnet_dims[-1]), jnp.float32)
    bf = 0.1 * jax.random.normal(kb, (mm,), jnp.float32).reshape(1, mm)
    params.append((wf, bf))
    return params


# ------------------------------ pure-JAX ref ---------------------------------

def tnet_reference(x, params, matrix_size):
    """Module-semantics reference mirroring the kernel's precision policy
    (eval-mode BN folded into bf16 weights, bf16 matmul inputs, f32 accum)."""
    (w1, s1, b1), (w2, s2, b2), (w3, s3, b3), (w4, s4, b4), (wf, bf) = params
    B = x.shape[0]
    fold = lambda w, s: (w.T * s).astype(jnp.bfloat16)
    dot = lambda a, w: jnp.einsum("...c,cd->...d", a.astype(jnp.bfloat16), w,
                                  preferred_element_type=jnp.float32)
    h = jnp.maximum(dot(x, fold(w1, s1)) + b1, 0.0)
    h = jnp.maximum(dot(h, fold(w2, s2)) + b2, 0.0)
    g = jnp.max(h, axis=1)
    g = jnp.maximum(dot(g, fold(w3, s3)) + b3, 0.0)
    g = jnp.maximum(dot(g, fold(w4, s4)) + b4, 0.0)
    out = dot(g, wf.T.astype(jnp.bfloat16)) + bf
    return out.reshape(B, matrix_size, matrix_size)


# ---------------------------------- main -------------------------------------

if __name__ == "__main__":
    B, N, CIN = 2, 200, 4          # batch, num_points, in_features
    LNET = [32, 64]                # SharedFCBlock out_features
    GNET = [32, 16]                # FCBlock out_features
    MSIZE = 4                      # matrix_size -> output (B, 4, 4)

    key = jax.random.PRNGKey(0)
    kx, kp = jax.random.split(key)
    x = jax.random.normal(kx, (B, N, CIN), jnp.float32)
    params = init_params(kp, CIN, LNET, GNET, MSIZE)

    ref = tnet_reference(x, params, MSIZE)

    # Default path: single points tile per batch (n_tiles == 1).
    out = jax.block_until_ready(tnet_forward(x, params, MSIZE))
    assert out.shape == (B, MSIZE, MSIZE), out.shape
    assert jnp.allclose(out, ref, rtol=2e-3, atol=2e-3), (
        "mismatch vs reference (single tile), max|diff|=%f"
        % float(jnp.max(jnp.abs(out - ref))))

    # Also exercise the multi-tile running-max path (N=200, tile_n=128 -> 2 tiles).
    out2 = jax.block_until_ready(tnet_forward(x, params, MSIZE, tile_n=128))
    assert jnp.allclose(out2, ref, rtol=2e-3, atol=2e-3), (
        "mismatch vs reference (multi tile), max|diff|=%f"
        % float(jnp.max(jnp.abs(out2 - ref))))

    print("KERNEL_OK")
</pallas_src>

<mosaic_0001>
module attributes {stable_mosaic.version = 11 : i64} {
  func.func @lnet_pool_kernel(%arg0: i32, %arg1: i32, %arg2: memref<1x16x256xbf16, #tpu.memory_space<vmem>>, %arg3: memref<128x16xbf16, #tpu.memory_space<vmem>>, %arg4: memref<128x1xf32, #tpu.memory_space<vmem>>, %arg5: memref<128x128xbf16, #tpu.memory_space<vmem>>, %arg6: memref<128x1xf32, #tpu.memory_space<vmem>>, %arg7: memref<1x128x1xf32, #tpu.memory_space<vmem>>) attributes {dimension_semantics = [#tpu.dimension_semantics<parallel>, #tpu.dimension_semantics<arbitrary>], iteration_bounds = array<i64: 2, 1>, scalar_prefetch = 0 : i64, scratch_operands = 0 : i64, tpu.core_type = #tpu.core_type<tc>, window_params = [{transform_indices = @transform_0, window_bounds = array<i64: 1, 16, 256>}, {pipeline_mode = #tpu.pipeline_mode<synchronous>, transform_indices = @transform_1, window_bounds = array<i64: 128, 16>}, {pipeline_mode = #tpu.pipeline_mode<synchronous>, transform_indices = @transform_2, window_bounds = array<i64: 128, 1>}, {pipeline_mode = #tpu.pipeline_mode<synchronous>, transform_indices = @transform_3, window_bounds = array<i64: 128, 128>}, {pipeline_mode = #tpu.pipeline_mode<synchronous>, transform_indices = @transform_4, window_bounds = array<i64: 128, 1>}, {transform_indices = @transform_5, window_bounds = array<i64: 1, 128, 1>}]} {
    %c0 = arith.constant 0 : index
    %c0_0 = arith.constant 0 : index
    %c0_1 = arith.constant 0 : index
    %0 = vector.load %arg2[%c0, %c0_0, %c0_1] : memref<1x16x256xbf16, #tpu.memory_space<vmem>>, vector<1x16x256xbf16>
    %1 = vector.shape_cast %0 : vector<1x16x256xbf16> to vector<16x256xbf16>
    %c0_2 = arith.constant 0 : index
    %c0_3 = arith.constant 0 : index
    %2 = vector.load %arg3[%c0_2, %c0_3] : memref<128x16xbf16, #tpu.memory_space<vmem>>, vector<128x16xbf16>
    %cst = arith.constant dense<0.000000e+00> : vector<128x256xf32>
    %3 = tpu.matmul %2, %1, %cst {dimension_numbers = #tpu.dot_dimension_numbers<[1], [0], [0], [1], [0, 0, 1, 1], [], []>} : vector<128x16xbf16>, vector<16x256xbf16>, vector<128x256xf32> -> vector<128x256xf32>
    %c0_4 = arith.constant 0 : index
    %c0_5 = arith.constant 0 : index
    %4 = vector.load %arg4[%c0_4, %c0_5] : memref<128x1xf32, #tpu.memory_space<vmem>>, vector<128x1xf32>
    %5 = vector.broadcast %4 : vector<128x1xf32> to vector<128x256xf32>
    %6 = arith.addf %3, %5 : vector<128x256xf32>
    %cst_6 = arith.constant 0.000000e+00 : f32
    %7 = vector.broadcast %cst_6 : f32 to vector<128x256xf32>
    %8 = arith.maximumf %6, %7 : vector<128x256xf32>
    %c0_7 = arith.constant 0 : index
    %c0_8 = arith.constant 0 : index
    %9 = vector.load %arg5[%c0_7, %c0_8] : memref<128x128xbf16, #tpu.memory_space<vmem>>, vector<128x128xbf16>
    %10 = arith.truncf %8 : vector<128x256xf32> to vector<128x256xbf16>
    %cst_9 = arith.constant dense<0.000000e+00> : vector<128x256xf32>
    %11 = tpu.matmul %9, %10, %cst_9 {dimension_numbers = #tpu.dot_dimension_numbers<[1], [0], [0], [1], [0, 0, 1, 1], [], []>} : vector<128x128xbf16>, vector<128x256xbf16>, vector<128x256xf32> -> vector<128x256xf32>
    %c0_10 = arith.constant 0 : index
    %c0_11 = arith.constant 0 : index
    %12 = vector.load %arg6[%c0_10, %c0_11] : memref<128x1xf32, #tpu.memory_space<vmem>>, vector<128x1xf32>
    %13 = vector.broadcast %12 : vector<128x1xf32> to vector<128x256xf32>
    %14 = arith.addf %11, %13 : vector<128x256xf32>
    %cst_12 = arith.constant 0.000000e+00 : f32
    %15 = vector.broadcast %cst_12 : f32 to vector<128x256xf32>
    %16 = arith.maximumf %14, %15 : vector<128x256xf32>
    %cst_13 = arith.constant dense<0xFF800000> : vector<128xf32>
    %17 = vector.multi_reduction <maximumf>, %16, %cst_13 [1] : vector<128x256xf32> to vector<128xf32>
    %18 = vector.shape_cast %17 : vector<128xf32> to vector<128x1xf32>
    %c0_i32 = arith.constant 0 : i32
    %19 = arith.cmpi eq, %arg1, %c0_i32 : i32
    %20 = arith.extui %19 : i1 to i32
    %c0_i32_14 = arith.constant 0 : i32
    %21 = arith.cmpi ne, %20, %c0_i32_14 : i32
    scf.if %21 {
      %c0_17 = arith.constant 0 : index
      %c0_18 = arith.constant 0 : index
      %c0_19 = arith.constant 0 : index
      %25 = vector.load %arg7[%c0_17, %c0_18, %c0_19] : memref<1x128x1xf32, #tpu.memory_space<vmem>>, vector<1x128x1xf32>
      %26 = vector.shape_cast %25 : vector<1x128x1xf32> to vector<128x1xf32>
      %27 = vector.shape_cast %18 : vector<128x1xf32> to vector<1x128x1xf32>
      tpu.vector_store %arg7[%c0_17, %c0_18, %c0_19], %27 {strides = array<i32>} : memref<1x128x1xf32, #tpu.memory_space<vmem>>, vector<1x128x1xf32>,
    } else {
    }
    %c0_i32_15 = arith.constant 0 : i32
    %22 = arith.cmpi ne, %arg1, %c0_i32_15 : i32
    %23 = arith.extui %22 : i1 to i32
    %c0_i32_16 = arith.constant 0 : i32
    %24 = arith.cmpi ne, %23, %c0_i32_16 : i32
    scf.if %24 {
      %c0_17 = arith.constant 0 : index
      %c0_18 = arith.constant 0 : index
      %c0_19 = arith.constant 0 : index
      %25 = vector.load %arg7[%c0_17, %c0_18, %c0_19] : memref<1x128x1xf32, #tpu.memory_space<vmem>>, vector<1x128x1xf32>
      %26 = vector.shape_cast %25 : vector<1x128x1xf32> to vector<128x1xf32>
      %27 = arith.maximumf %26, %18 : vector<128x1xf32>
      %c0_20 = arith.constant 0 : index
      %c0_21 = arith.constant 0 : index
      %c0_22 = arith.constant 0 : index
      %28 = vector.load %arg7[%c0_20, %c0_21, %c0_22] : memref<1x128x1xf32, #tpu.memory_space<vmem>>, vector<1x128x1xf32>
      %29 = vector.shape_cast %28 : vector<1x128x1xf32> to vector<128x1xf32>
      %30 = vector.shape_cast %27 : vector<128x1xf32> to vector<1x128x1xf32>
      tpu.vector_store %arg7[%c0_20, %c0_21, %c0_22], %30 {strides = array<i32>} : memref<1x128x1xf32, #tpu.memory_space<vmem>>, vector<1x128x1xf32>,
    } else {
    }
    return
  }
  func.func @transform_0(%arg0: i32, %arg1: i32) -> (i32, i32, i32) {
    %c0_i32 = arith.constant 0 : i32
    %c0_i32_0 = arith.constant 0 : i32
    return %arg0, %c0_i32, %arg1 : i32, i32, i32
  }
  func.func @transform_1(%arg0: i32, %arg1: i32) -> (i32, i32) {
    %c0_i32 = arith.constant 0 : i32
    %c0_i32_0 = arith.constant 0 : i32
    %c0_i32_1 = arith.constant 0 : i32
    return %c0_i32, %c0_i32_0 : i32, i32
  }
  func.func @transform_2(%arg0: i32, %arg1: i32) -> (i32, i32) {
    %c0_i32 = arith.constant 0 : i32
    %c0_i32_0 = arith.constant 0 : i32
    %c0_i32_1 = arith.constant 0 : i32
    return %c0_i32, %c0_i32_0 : i32, i32
  }
  func.func @transform_3(%arg0: i32, %arg1: i32) -> (i32, i32) {
    %c0_i32 = arith.constant 0 : i32
    %c0_i32_0 = arith.constant 0 : i32
    %c0_i32_1 = arith.constant 0 : i32
    return %c0_i32, %c0_i32_0 : i32, i32
  }
  func.func @transform_4(%arg0: i32, %arg1: i32) -> (i32, i32) {
    %c0_i32 = arith.constant 0 : i32
    %c0_i32_0 = arith.constant 0 : i32
    %c0_i32_1 = arith.constant 0 : i32
    return %c0_i32, %c0_i32_0 : i32, i32
  }
  func.func @transform_5(%arg0: i32, %arg1: i32) -> (i32, i32, i32) {
    %c0_i32 = arith.constant 0 : i32
    %c0_i32_0 = arith.constant 0 : i32
    %c0_i32_1 = arith.constant 0 : i32
    return %arg0, %c0_i32, %c0_i32_0 : i32, i32, i32
  }
}

</mosaic_0001>

<bundles_post_ra>
// kernel: tpu_custom_call.1
= control target key start
LH: loop header
LB: loop body
LE: loop exit
PB: predicated region body
PF: predicated region fallthrough
CT: control target
= control target key end

     0   :  { %s1272_s18 = smov 0   ;;  %s1274_s19 = smov 0   ;;  %s1559_s0 = inlined_call_operand.vmem [shape: bf16[2,16,256], index: 0, kind: input, shape index: {}]   ;;  %s1560_s1 = inlined_call_operand.vmem [shape: bf16[128,16], index: 1, kind: input, shape index: {}]   ;;  %s1561_s2 = inlined_call_operand.vmem [shape: f32[128,1], index: 2, kind: input, shape index: {}]   ;;  %s1562_s3 = inlined_call_operand.vmem [shape: bf16[128,128], index: 3, kind: input, shape index: {}]   ;;  %s1563_s4 = inlined_call_operand.vmem [shape: f32[128,1], index: 4, kind: input, shape index: {}]   ;;  %s1564_s5 = inlined_call_operand.vmem [shape: f32[2,128,1], index: 5, kind: output, shape index: {}]  }
   0x1   :  { %s1276_s20 = smov 0  }
   0x2 LB: > { %s27_s21 = sadd.s32 1, %s1235_s19  ;;  %p1074_p0 = scmp.ge.s32.totalorder %s1239_s20, 1  ;;  %s1239_s20 = sphi %s1276_s20, %s15_s20   ;;  %s1235_s19 = sphi %s1274_s19, %s1566_s19   ;;  %s1231_s18 = sphi %s1272_s18, %s1565_s18  }
   0x3   : > { %p29_p1 = scmp.ge.s32.totalorder %s27_s21, 2  ;;  %p206_p2 = scmp.lt.s32.totalorder %s1239_s20, 3 }
   0x5   : > { %s1568_s21 = smov (%p29_p1, %s27_s21), 0  ;;  %p207_p3 = pnand %p1074_p0, %p206_p2 }
   0x6   : > { %p239_p4 = scmp.lt.s32.totalorder (!%p207_p3), %s1231_s18, 1 }
   0x7   : > { %210 = sbr.rel (%p207_p3) target bundleno = 680 (0x2a8), region = 40 }
   0xc   : > { %v286_v0 = vld [vmem:[%s1561_s2 + $0x70] sm:$0xff]  ;;  %v1241_v1 = vmov 0   ;;  %v284_v2 = vld [vmem:[%s1561_s2 + $0x60] sm:$0xff]  ;;  %s1570_s18 = smov (!%p239_p4, %s1231_s18), 1  ;;  %v287_v9 = vld [vmem:[%s1561_s2 + $0x78] sm:$0xff]  ;;  %vm418_vm0 = vcmask 130048  }
   0xd   : > { %1214 = vset.pattern.permute.xlu0 %v1241_v1  ;;  %1216 = vset.pattern.permute.xlu2 %v1241_v1  ;;  %v282_v3 = vld [vmem:[%s1561_s2 + $0x50] sm:$0xff]  ;;  %s1169_s28 = sshll.u32 %s1570_s18, 4  ;;  %v1173_v11 = vld [vmem:[%s1560_s1] sm:$0xff]  ;;  %v285_v12 = vld [vmem:[%s1561_s2 + $0x68] sm:$0xff]  ;;  %s1170_s13 = sshll.u32 %s1570_s18, 7  ;;  %vm931_vm1 = vcmask 7168  }
   0xe   : > { %360 = vperm.xlu0 %1214, %v286_v0   ;;  %1215 = vset.pattern.permute.xlu1 %v1241_v1  ;;  %s246_s6 = scalar_lea.vmem %s1559_s0, %s1169_s28  ;;  %v283_v13 = vld [vmem:[%s1561_s2 + $0x58] sm:$0xff]  ;;  %v280_v14 = vld [vmem:[%s1561_s2 + $0x40] sm:$0xff]  ;;  %v281_v15 = vld [vmem:[%s1561_s2 + $0x48] sm:$0xff]  ;;  %s1516_s16 = scalar_lea.vmem %s1564_s5, %s1170_s13 }
   0xf   : > { %350 = vperm.xlu1 %1215, %v284_v2   ;;  %340 = vperm.xlu2 %1216, %v282_v3   ;;  %v1113_v4 = vld [vmem:[%s246_s6] sm:$0xf]  ;;  %v1172_v5 = vld [vmem:[%s246_s6 + $0x4] sm:$0xf0]  ;;  %v1171_v6 = vld [vmem:[%s246_s6 + $0x4] sm:$0xf] }
  0x10   : > { %v1114_v7 = vor.u32 %v1172_v5, %v1113_v4  ;;  %v1115_v8 = vld [vmem:[%s246_s6 + $0x8] sm:$0xf0]  ;;  %v278_v16 = vld [vmem:[%s1561_s2 + $0x30] sm:$0xff]  ;;  %v279_v17 = vld [vmem:[%s1561_s2 + $0x38] sm:$0xff] }
  0x11   : > { %v1118_v10 = vor.u32 %v1171_v6, %v1115_v8  ;;  %v1174_v18 = vld [vmem:[%s1560_s1 + $0x8] sm:$0xff]  ;;  %v276_v20 = vld [vmem:[%s1561_s2 + $0x20] sm:$0xff]  ;;  %v274_v21 = vld [vmem:[%s1561_s2 + $0x10] sm:$0xff] }
  0x12   : > { %450 = vmatpush.bf16.msra.mxu0 %v1114_v7  ;;  %v277_v19 = vld [vmem:[%s1561_s2 + $0x28] sm:$0xff]  ;;  %v275_v22 = vld [vmem:[%s1561_s2 + $0x18] sm:$0xff]  ;;  %v272_v23 = vld [vmem:[%s1561_s2] sm:$0xff] }
  0x13   : > { %499 = vmatpush.bf16.msra.mxu1 %v1118_v10  ;;  %v273_v24 = vld [vmem:[%s1561_s2 + $0x8] sm:$0xff]  ;;  %v1175_v25 = vld [vmem:[%s1560_s1 + $0x10] sm:$0xff]  ;;  %v1176_v26 = vld [vmem:[%s1560_s1 + $0x18] sm:$0xff] }
  0x14   : > { %v605_v27 = vld [vmem:[%s1563_s4] sm:$0xff]  ;;  %v607_v28 = vld [vmem:[%s1563_s4 + $0x10] sm:$0xff]  ;;  %v608_v29 = vld [vmem:[%s1563_s4 + $0x18] sm:$0xff] }
  0x15   : > { %1119 = vmatmul.msk.bf16.vlgmr.msra.gmra.mxu0 %vm418_vm0, %v1173_v11  ;;  %v610_v30 = vld [vmem:[%s1563_s4 + $0x28] sm:$0xff]  ;;  %v1177_v31 = vld [vmem:[%s1560_s1 + $0x20] sm:$0xff]  ;;  %v611_v32 = vld [vmem:[%s1563_s4 + $0x30] sm:$0xff] }
  0x16   : > { %365 = vperm.xlu0 %1214, %v287_v9   ;;  %1127 = vmatmul.msk.bf16.vlgmr.msra.gmra.mxu1 %vm418_vm0, %v1173_v11  ;;  %v613_v33 = vld [vmem:[%s1563_s4 + $0x40] sm:$0xff]  ;;  %v614_v34 = vld [vmem:[%s1563_s4 + $0x48] sm:$0xff]  ;;  %v616_v35 = vld [vmem:[%s1563_s4 + $0x58] sm:$0xff] }
  0x17   : > { %355 = vperm.xlu1 %1215, %v285_v12   ;;  %345 = vperm.xlu2 %1216, %v283_v13   ;;  %v1178_v36 = vld [vmem:[%s1560_s1 + $0x28] sm:$0xff]  ;;  %v617_v37 = vld [vmem:[%s1563_s4 + $0x60] sm:$0xff]  ;;  %v619_v38 = vld [vmem:[%s1563_s4 + $0x70] sm:$0xff] }
  0x18   : > { %v606_v39 = vld [vmem:[%s1563_s4 + $0x8] sm:$0xff]  ;;  %v620_v40 = vld [vmem:[%s1563_s4 + $0x78] sm:$0xff]  ;;  %v1179_v41 = vld [vmem:[%s1560_s1 + $0x30] sm:$0xff] }
  0x19   : > { %v609_v42 = vld [vmem:[%s1563_s4 + $0x20] sm:$0xff]  ;;  %v612_v44 = vld [vmem:[%s1563_s4 + $0x38] sm:$0xff]  ;;  %v615_v49 = vld [vmem:[%s1563_s4 + $0x50] sm:$0xff] }
  0x1a   : > { %v1180_v47 = vld [vmem:[%s1560_s1 + $0x38] sm:$0xff]  ;;  %v618_v52 = vld [vmem:[%s1563_s4 + $0x68] sm:$0xff] }
  0x1e   : > { %330 = vperm.xlu0 %1214, %v280_v14  }
  0x1f   : > { %335 = vperm.xlu1 %1215, %v281_v15   ;;  %320 = vperm.xlu2 %1216, %v278_v16  }
  0x25   : > { %1120 = vmatmul.msk.bf16.gmra.mxu0 %vm418_vm0, %v1174_v18 }
  0x26   : > { %325 = vperm.xlu0 %1214, %v279_v17   ;;  %1128 = vmatmul.msk.bf16.gmra.mxu1 %vm418_vm0, %v1174_v18 }
  0x27   : > { %315 = vperm.xlu2 %1216, %v277_v19   ;;  %310 = vperm.xlu1 %1215, %v276_v20  }
  0x2e   : > { %300 = vperm.xlu0 %1214, %v274_v21  }
  0x2f   : > { %305 = vperm.xlu1 %1215, %v275_v22   ;;  %290 = vperm.xlu2 %1216, %v272_v23  }
  0x35   : > { %1121 = vmatmul.msk.bf16.gmra.mxu0 %vm418_vm0, %v1175_v25 }
  0x36   : > { %295 = vperm.xlu0 %1214, %v273_v24   ;;  %1129 = vmatmul.msk.bf16.gmra.mxu1 %vm418_vm0, %v1175_v25 }
  0x37   : > { %623 = vperm.xlu1 %1215, %v605_v27   ;;  %628 = vperm.xlu2 %1216, %v606_v39  }
  0x3e   : > { %633 = vperm.xlu0 %1214, %v607_v28  }
  0x3f   : > { %638 = vperm.xlu1 %1215, %v608_v29   ;;  %643 = vperm.xlu2 %1216, %v609_v42  }
  0x45   : > { %1122 = vmatmul.msk.bf16.gmra.mxu0 %vm418_vm0, %v1176_v26 }
  0x46   : > { %1130 = vmatmul.msk.bf16.gmra.mxu1 %vm418_vm0, %v1176_v26  ;;  %648 = vperm.xlu0 %1214, %v610_v30  }
  0x47   : > { %653 = vperm.xlu1 %1215, %v611_v32   ;;  %658 = vperm.xlu2 %1216, %v612_v44  }
  0x4e   : > { %663 = vperm.xlu0 %1214, %v613_v33  }
  0x4f   : > { %668 = vperm.xlu1 %1215, %v614_v34   ;;  %673 = vperm.xlu2 %1216, %v615_v49  }
  0x55   : > { %1123 = vmatmul.msk.bf16.gmra.mxu0 %vm418_vm0, %v1177_v31 }
  0x56   : > { %1131 = vmatmul.msk.bf16.gmra.mxu1 %vm418_vm0, %v1177_v31  ;;  %678 = vperm.xlu0 %1214, %v616_v35  }
  0x57   : > { %683 = vperm.xlu1 %1215, %v617_v37   ;;  %688 = vperm.xlu2 %1216, %v618_v52  }
  0x5e   : > { %693 = vperm.xlu0 %1214, %v619_v38  }
  0x5f   : > { %698 = vperm.xlu1 %1215, %v620_v40  }
  0x65   : > { %1124 = vmatmul.msk.bf16.gmra.mxu0 %vm418_vm0, %v1178_v36 }
  0x66   : > { %1132 = vmatmul.msk.bf16.gmra.mxu1 %vm418_vm0, %v1178_v36 }
  0x69   : > { %v1418_v43 = vpop.permute.xlu2 %340 }
  0x71   : > { %v1430_v48 = vpop.permute.xlu2 %345 }
  0x75   : > { %1125 = vmatmul.msk.bf16.gmra.mxu0 %vm418_vm0, %v1179_v41 }
  0x76   : > { %1133 = vmatmul.msk.bf16.gmra.mxu1 %vm418_vm0, %v1179_v41 }
  0x79   : > { %v321_v53 = vpop.permute.xlu2 %320 }
  0x80   : > { %v1423_v45 = vpop.permute.xlu0 %360 }
  0x81   : > { %v1425_v46 = vpop.permute.xlu1 %350  ;;  %v316_v59 = vpop.permute.xlu2 %315 }
  0x85   : > { %1126 = vmatmul.msk.bf16.gmra.mxu0 %vm418_vm0, %v1180_v47 }
  0x86   : > { %1134 = vmatmul.msk.bf16.gmra.mxu1 %vm418_vm0, %v1180_v47 }
  0x88   : > { %v1435_v50 = vpop.permute.xlu0 %365 }
  0x89   : > { %v1439_v51 = vpop.permute.xlu1 %355  ;;  %v291_v0 = vpop.permute.xlu2 %290 }
  0x90   : > { %v1444_v54 = vpop.permute.xlu0 %330 }
  0x91   : > { %v1446_v57 = vpop.permute.xlu1 %335 }
  0x92   : > { %v452_v55 = vpop.f32.mrf.mxu0 }
  0x93   : > { %v501_v56 = vpop.f32.mrf.mxu1  ;;  %v453_v3 = vadd.f32 %v452_v55, %v291_v0 }
  0x94   : > { %v502_v4 = vadd.f32 %v501_v56, %v291_v0 }
  0x95   : > { %v541_v8 = vmax.f32 %v453_v3, 0.0 }
  0x96   : > { %v542_v9 = vmax.f32 %v502_v4, 0.0 }
  0x98   : > { %v326_v58 = vpop.permute.xlu0 %325 }
  0x99   : > { %v311_v63 = vpop.permute.xlu1 %310 }
  0x9a   : > { %v454_v60 = vpop.f32.mrf.mxu0 }
  0x9b   : > { %v503_v61 = vpop.f32.mrf.mxu1 }
  0xa0   : > { %v301_v62 = vpop.permute.xlu0 %300 }
  0xa1   : > { %v306_v12 = vpop.permute.xlu1 %305 }
  0xa2   : > { %v457_v1 = vpop.f32.mrf.mxu0 }
  0xa3   : > { %v506_v2 = vpop.f32.mrf.mxu1  ;;  %v458_v13 = vadd.f32 %v457_v1, %v301_v62 }
  0xa4   : > { %v507_v14 = vadd.f32 %v506_v2, %v301_v62 }
  0xa5   : > { %v545_v21 = vmax.f32 %v458_v13, 0.0 }
  0xa6   : > { %v546_v23 = vmax.f32 %v507_v14, 0.0 }
  0xa8   : > { %v296_v5 = vpop.permute.xlu0 %295 }
  0xa9   : > { %v455_v6 = vadd.f32 %v454_v60, %v296_v5  ;;  %v504_v7 = vadd.f32 %v503_v61, %v296_v5 }
  0xaa   : > { %v459_v15 = vpop.f32.mrf.mxu0 }
  0xab   : > { %v543_v10 = vmax.f32 %v455_v6, 0.0  ;;  %v544_v11 = vmax.f32 %v504_v7, 0.0  ;;  %v460_v18 = vadd.f32 %v459_v15, %v306_v12  ;;  %v508_v19 = vpop.f32.mrf.mxu1 }
  0xac   : > { %v509_v20 = vadd.f32 %v508_v19, %v306_v12 }
  0xad   : > { %v1448_v16 = vpack.c.bf16 %v543_v10, %v541_v8  ;;  %v1450_v17 = vpack.c.bf16 %v544_v11, %v542_v9  ;;  %v547_v22 = vmax.f32 %v460_v18, 0.0 }
  0xae   : > { %v548_v24 = vmax.f32 %v509_v20, 0.0 }
  0xaf   : > { %v1452_v25 = vpack.c.bf16 %v547_v22, %v545_v21 }
  0xb0   : > { %v1454_v26 = vpack.c.bf16 %v548_v24, %v546_v23 }
  0xb2   : > { %v462_v27 = vpop.f32.mrf.mxu0 }
  0xb3   : > { %v511_v28 = vpop.f32.mrf.mxu1  ;;  %v463_v29 = vadd.f32 %v462_v27, %v311_v63 }
  0xb4   : > { %v512_v30 = vadd.f32 %v511_v28, %v311_v63 }
  0xb5   : > { %v549_v35 = vmax.f32 %v463_v29, 0.0 }
  0xb6   : > { %v550_v37 = vmax.f32 %v512_v30, 0.0 }
  0xba   : > { %v464_v31 = vpop.f32.mrf.mxu0 }
  0xbb   : > { %v465_v32 = vadd.f32 %v464_v31, %v316_v59  ;;  %v513_v33 = vpop.f32.mrf.mxu1 }
  0xbc   : > { %v514_v34 = vadd.f32 %v513_v33, %v316_v59 }
  0xbd   : > { %v551_v36 = vmax.f32 %v465_v32, 0.0 }
  0xbe   : > { %v552_v38 = vmax.f32 %v514_v34, 0.0 }
  0xbf   : > { %v1456_v39 = vpack.c.bf16 %v551_v36, %v549_v35 }
  0xc0   : > { %v1458_v40 = vpack.c.bf16 %v552_v38, %v550_v37 }
  0xc2   : > { %v467_v41 = vpop.f32.mrf.mxu0 }
  0xc3   : > { %v516_v42 = vpop.f32.mrf.mxu1  ;;  %v468_v44 = vadd.f32 %v467_v41, %v321_v53 }
  0xc4   : > { %v517_v47 = vadd.f32 %v516_v42, %v321_v53 }
  0xc5   : > { %v553_v60 = vmax.f32 %v468_v44, 0.0 }
  0xc6   : > { %v554_v62 = vmax.f32 %v517_v47, 0.0 }
  0xca   : > { %v469_v49 = vpop.f32.mrf.mxu0 }
  0xcb   : > { %v470_v52 = vadd.f32 %v469_v49, %v326_v58  ;;  %v518_v55 = vpop.f32.mrf.mxu1 }
  0xcc   : > { %v519_v56 = vadd.f32 %v518_v55, %v326_v58 }
  0xcd   : > { %v555_v61 = vmax.f32 %v470_v52, 0.0 }
  0xce   : > { %v556_v59 = vmax.f32 %v519_v56, 0.0 }
  0xcf   : > { %v1460_v63 = vpack.c.bf16 %v555_v61, %v553_v60 }
  0xd0   : > { %v1462_v0 = vpack.c.bf16 %v556_v59, %v554_v62 }
  0xd2   : > { %v472_v1 = vpop.f32.mrf.mxu0 }
  0xd3   : > { %v521_v2 = vpop.f32.mrf.mxu1 }
  0xd4   : > { %v522_v52 = vadd.f32 %v521_v2, %v1444_v54 }
  0xd6   : > { %v558_v59 = vmax.f32 %v522_v52, 0.0 }
  0xda   : > { %v474_v3 = vpop.f32.mrf.mxu0 }
  0xdb   : > { %v523_v4 = vpop.f32.mrf.mxu1 }
  0xdc   : > { %v524_v42 = vadd.f32 %v523_v4, %v1446_v57 }
  0xde   : > { %v560_v60 = vmax.f32 %v524_v42, 0.0 }
  0xe2   : > { %v477_v5 = vpop.f32.mrf.mxu0 }
  0xe3   : > { %v526_v6 = vpop.f32.mrf.mxu1 }
  0xea   : > { %v479_v7 = vpop.f32.mrf.mxu0 }
  0xeb   : > { %v528_v53 = vpop.f32.mrf.mxu1 }
  0xec   : > { %v529_v33 = vadd.f32 %v528_v53, %v1430_v48 }
  0xee   : > { %v564_v44 = vmax.f32 %v529_v33, 0.0 }
  0xf2   : > { %v482_v8 = vpop.f32.mrf.mxu0 }
  0xf3   : > { %v531_v9 = vpop.f32.mrf.mxu1  ;;  %v483_v23 = vadd.f32 %v482_v8, %v1425_v46  ;;  %v629_v8 = vpop.permute.xlu2 %628 }
  0xf4   : > { %v532_v28 = vadd.f32 %v531_v9, %v1425_v46  ;;  %v475_v46 = vadd.f32 %v474_v3, %v1446_v57  ;;  %v598_v57 = vpack.c.bf16 %v560_v60, %v558_v59 }
  0xf5   : > { %v565_v36 = vmax.f32 %v483_v23, 0.0 }
  0xf6   : > { %v566_v37 = vmax.f32 %v532_v28, 0.0  ;;  %v559_v56 = vmax.f32 %v475_v46, 0.0 }
  0xfa   : > { %v484_v10 = vpop.f32.mrf.mxu0 }
  0xfb   : > { %v533_v58 = vpop.f32.mrf.mxu1  ;;  %v485_v18 = vadd.f32 %v484_v10, %v1439_v51 }
  0xfc   : > { %v534_v21 = vadd.f32 %v533_v58, %v1439_v51  ;;  %v478_v51 = vadd.f32 %v477_v5, %v1418_v43 }
  0xfd   : > { %v567_v31 = vmax.f32 %v485_v18, 0.0 }
  0xfe   : > { %v568_v34 = vmax.f32 %v534_v21, 0.0  ;;  %v561_v49 = vmax.f32 %v478_v51, 0.0 }
  0xff   : > { %v601_v41 = vpack.c.bf16 %v567_v31, %v565_v36 }
 0x100   : > { %v602_v47 = vpack.c.bf16 %v568_v34, %v566_v37  ;;  %v644_v34 = vpop.permute.xlu2 %643 }
 0x102   : > { %v487_v11 = vpop.f32.mrf.mxu0 }
 0x103   : > { %v536_v12 = vpop.f32.mrf.mxu1  ;;  %v488_v13 = vadd.f32 %v487_v11, %v1423_v45 }
 0x104   : > { %v537_v14 = vadd.f32 %v536_v12, %v1423_v45  ;;  %v480_v45 = vadd.f32 %v479_v7, %v1430_v48  ;;  %v473_v48 = vadd.f32 %v472_v1, %v1444_v54  ;;  %v1181_v54 = vld [vmem:[%s1562_s3] sm:$0xff] }
 0x105   : > { %v569_v24 = vmax.f32 %v488_v13, 0.0 }
 0x106   : > { %v570_v29 = vmax.f32 %v537_v14, 0.0  ;;  %v563_v38 = vmax.f32 %v480_v45, 0.0  ;;  %v557_v62 = vmax.f32 %v473_v48, 0.0 }
 0x108   : > { %v597_v3 = vpack.c.bf16 %v559_v56, %v557_v62 }
 0x10a   : > { %v489_v15 = vpop.f32.mrf.mxu0 }
 0x10b   : > { %v490_v19 = vadd.f32 %v489_v15, %v1435_v50  ;;  %v538_v20 = vpop.f32.mrf.mxu1  ;;  %v634_v15 = vpop.permute.xlu0 %633 }
 0x10c   : > { %v539_v22 = vadd.f32 %v538_v20, %v1435_v50  ;;  %v527_v50 = vadd.f32 %v526_v6, %v1418_v43  ;;  %v599_v43 = vpack.c.bf16 %v563_v38, %v561_v49 }
 0x10d   : > { %v571_v27 = vmax.f32 %v490_v19, 0.0 }
 0x10e   : > { %v572_v30 = vmax.f32 %v539_v22, 0.0  ;;  %v562_v55 = vmax.f32 %v527_v50, 0.0 }
 0x10f   : > { %v603_v32 = vpack.c.bf16 %v571_v27, %v569_v24 }
 0x110   : > { %v604_v35 = vpack.c.bf16 %v572_v30, %v570_v29  ;;  %v600_v61 = vpack.c.bf16 %v564_v44, %v562_v55 }
 0x111   : > { %749 = vmatpush.bf16.msra.mxu2 %v603_v32 }
 0x112   : > { %798 = vmatpush.bf16.msra.mxu3 %v604_v35 }
 0x115   : > { %750 = vmatpush.bf16.msra.mxu2 %v601_v41  ;;  %v649_v41 = vpop.permute.xlu0 %648 }
 0x116   : > { %799 = vmatpush.bf16.msra.mxu3 %v602_v47 }
 0x119   : > { %751 = vmatpush.bf16.msra.mxu2 %v599_v43 }
 0x11a   : > { %800 = vmatpush.bf16.msra.mxu3 %v600_v61 }
 0x11d   : > { %752 = vmatpush.bf16.msra.mxu2 %v597_v3 }
 0x11e   : > { %801 = vmatpush.bf16.msra.mxu3 %v598_v57 }
 0x121   : > { %753 = vmatpush.bf16.msra.mxu2 %v1460_v63  ;;  %v1188_v63 = vld [vmem:[%s1562_s3 + $0x38] sm:$0xff] }
 0x122   : > { %802 = vmatpush.bf16.msra.mxu3 %v1462_v0  ;;  %v624_v0 = vpop.permute.xlu1 %623 }
 0x125   : > { %754 = vmatpush.bf16.msra.mxu2 %v1456_v39  ;;  %v1182_v39 = vld [vmem:[%s1562_s3 + $0x8] sm:$0xff] }
 0x126   : > { %803 = vmatpush.bf16.msra.mxu3 %v1458_v40  ;;  %v1187_v40 = vld [vmem:[%s1562_s3 + $0x30] sm:$0xff] }
 0x129   : > { %755 = vmatpush.bf16.msra.mxu2 %v1452_v25  ;;  %v1183_v25 = vld [vmem:[%s1562_s3 + $0x10] sm:$0xff] }
 0x12a   : > { %804 = vmatpush.bf16.msra.mxu3 %v1454_v26  ;;  %v1186_v26 = vld [vmem:[%s1562_s3 + $0x28] sm:$0xff]  ;;  %v639_v27 = vpop.permute.xlu1 %638 }
 0x12d   : > { %756 = vmatpush.bf16.msra.mxu2 %v1448_v16  ;;  %v1184_v16 = vld [vmem:[%s1562_s3 + $0x18] sm:$0xff] }
 0x12e   : > { %805 = vmatpush.bf16.msra.mxu3 %v1450_v17  ;;  %v1185_v17 = vld [vmem:[%s1562_s3 + $0x20] sm:$0xff] }
 0x130   : > { %757 = vmatmul.bf16.vlgmr.msra.gmra.mxu2 %v1181_v54 }
 0x131   : > { %806 = vmatmul.bf16.vlgmr.msra.gmra.mxu3 %v1181_v54  ;;  %v659_v54 = vpop.permute.xlu2 %658 }
 0x132   : > { %v654_v56 = vpop.permute.xlu1 %653 }
 0x140   : > { %762 = vmatmul.bf16.gmra.mxu2 %v1182_v39 }
 0x141   : > { %811 = vmatmul.bf16.gmra.mxu3 %v1182_v39 }
 0x150   : > { %767 = vmatmul.bf16.gmra.mxu2 %v1183_v25 }
 0x151   : > { %816 = vmatmul.bf16.gmra.mxu3 %v1183_v25 }
 0x160   : > { %772 = vmatmul.bf16.gmra.mxu2 %v1184_v16 }
 0x161   : > { %821 = vmatmul.bf16.gmra.mxu3 %v1184_v16 }
 0x170   : > { %777 = vmatmul.bf16.gmra.mxu2 %v1185_v17 }
 0x171   : > { %826 = vmatmul.bf16.gmra.mxu3 %v1185_v17 }
 0x180   : > { %782 = vmatmul.bf16.gmra.mxu2 %v1186_v26 }
 0x181   : > { %831 = vmatmul.bf16.gmra.mxu3 %v1186_v26 }
 0x190   : > { %787 = vmatmul.bf16.gmra.mxu2 %v1187_v40 }
 0x191   : > { %836 = vmatmul.bf16.gmra.mxu3 %v1187_v40 }
 0x1a0   : > { %792 = vmatmul.bf16.gmra.mxu2 %v1188_v63 }
 0x1a1   : > { %841 = vmatmul.bf16.gmra.mxu3 %v1188_v63 }
 0x1b3   : > { %v758_v1 = vpop.f32.mrf.mxu2 }
 0x1b4   : > { %v759_v2 = vadd.f32 %v758_v1, %v624_v0  ;;  %v807_v4 = vpop.f32.mrf.mxu3 }
 0x1b5   : > { %v808_v5 = vadd.f32 %v807_v4, %v624_v0  ;;  %v664_v0 = vpop.permute.xlu0 %663 }
 0x1b6   : > { %v847_v6 = vmax.f32 %v759_v2, 0.0 }
 0x1b7   : > { %v848_v7 = vmax.f32 %v808_v5, 0.0 }
 0x1b9   : > { %v879_v53 = vmax.f32 %v847_v6, %v848_v7 }
 0x1bb   : > { %880 = vmax.xlane.f32.xlu2 %v879_v53  ;;  %v760_v9 = vpop.f32.mrf.mxu2 }
 0x1bc   : > { %v761_v10 = vadd.f32 %v760_v9, %v629_v8  ;;  %v809_v58 = vpop.f32.mrf.mxu3 }
 0x1bd   : > { %v810_v11 = vadd.f32 %v809_v58, %v629_v8  ;;  %v669_v8 = vpop.permute.xlu1 %668 }
 0x1be   : > { %v849_v12 = vmax.f32 %v761_v10, 0.0 }
 0x1bf   : > { %v850_v13 = vmax.f32 %v810_v11, 0.0 }
 0x1c1   : > { %v882_v14 = vmax.f32 %v849_v12, %v850_v13 }
 0x1c3   : > { %883 = vmax.xlane.f32.xlu0 %v882_v14  ;;  %v763_v18 = vpop.f32.mrf.mxu2 }
 0x1c4   : > { %v764_v19 = vadd.f32 %v763_v18, %v634_v15  ;;  %v812_v20 = vpop.f32.mrf.mxu3 }
 0x1c5   : > { %v813_v21 = vadd.f32 %v812_v20, %v634_v15  ;;  %v674_v15 = vpop.permute.xlu2 %673 }
 0x1c6   : > { %v851_v22 = vmax.f32 %v764_v19, 0.0 }
 0x1c7   : > { %v852_v23 = vmax.f32 %v813_v21, 0.0 }
 0x1c9   : > { %v885_v24 = vmax.f32 %v851_v22, %v852_v23 }
 0x1cb   : > { %886 = vmax.xlane.f32.xlu1 %v885_v24  ;;  %v765_v28 = vpop.f32.mrf.mxu2 }
 0x1cc   : > { %v766_v29 = vadd.f32 %v765_v28, %v639_v27  ;;  %v814_v30 = vpop.f32.mrf.mxu3 }
 0x1cd   : > { %v815_v45 = vadd.f32 %v814_v30, %v639_v27  ;;  %v679_v27 = vpop.permute.xlu0 %678 }
 0x1ce   : > { %v853_v31 = vmax.f32 %v766_v29, 0.0 }
 0x1cf   : > { %v854_v32 = vmax.f32 %v815_v45, 0.0 }
 0x1d1   : > { %v888_v33 = vmax.f32 %v853_v31, %v854_v32 }
 0x1d3   : > { %889 = vmax.xlane.f32.xlu2 %v888_v33  ;;  %v768_v35 = vpop.f32.mrf.mxu2 }
 0x1d4   : > { %v769_v51 = vadd.f32 %v768_v35, %v644_v34  ;;  %v817_v36 = vpop.f32.mrf.mxu3 }
 0x1d5   : > { %v818_v50 = vadd.f32 %v817_v36, %v644_v34  ;;  %v684_v34 = vpop.permute.xlu1 %683 }
 0x1d6   : > { %v855_v37 = vmax.f32 %v769_v51, 0.0 }
 0x1d7   : > { %v856_v46 = vmax.f32 %v818_v50, 0.0 }
 0x1d9   : > { %v891_v38 = vmax.f32 %v855_v37, %v856_v46 }
 0x1db   : > { %892 = vmax.xlane.f32.xlu2 %v891_v38  ;;  %v770_v42 = vpop.f32.mrf.mxu2 }
 0x1dc   : > { %v771_v44 = vadd.f32 %v770_v42, %v649_v41  ;;  %v819_v47 = vpop.f32.mrf.mxu3 }
 0x1dd   : > { %v820_v48 = vadd.f32 %v819_v47, %v649_v41  ;;  %v689_v41 = vpop.permute.xlu2 %688 }
 0x1de   : > { %v857_v49 = vmax.f32 %v771_v44, 0.0 }
 0x1df   : > { %v858_v52 = vmax.f32 %v820_v48, 0.0 }
 0x1e1   : > { %v894_v55 = vmax.f32 %v857_v49, %v858_v52 }
 0x1e3   : > { %895 = vmax.xlane.f32.xlu0 %v894_v55  ;;  %v773_v43 = vpop.f32.mrf.mxu2 }
 0x1e4   : > { %v774_v60 = vadd.f32 %v773_v43, %v654_v56  ;;  %v822_v61 = vpop.f32.mrf.mxu3 }
 0x1e5   : > { %v823_v62 = vadd.f32 %v822_v61, %v654_v56  ;;  %v694_v56 = vpop.permute.xlu0 %693 }
 0x1e6   : > { %v859_v59 = vmax.f32 %v774_v60, 0.0 }
 0x1e7   : > { %v860_v3 = vmax.f32 %v823_v62, 0.0 }
 0x1e9   : > { %v897_v57 = vmax.f32 %v859_v59, %v860_v3 }
 0x1eb   : > { %898 = vmax.xlane.f32.xlu1 %v897_v57  ;;  %v775_v39 = vpop.f32.mrf.mxu2 }
 0x1ec   : > { %v776_v25 = vadd.f32 %v775_v39, %v659_v54  ;;  %v824_v16 = vpop.f32.mrf.mxu3 }
 0x1ed   : > { %v825_v17 = vadd.f32 %v824_v16, %v659_v54  ;;  %v699_v54 = vpop.permute.xlu1 %698 }
 0x1ee   : > { %v861_v26 = vmax.f32 %v776_v25, 0.0 }
 0x1ef   : > { %v862_v40 = vmax.f32 %v825_v17, 0.0 }
 0x1f1   : > { %v900_v63 = vmax.f32 %v861_v26, %v862_v40 }
 0x1f3   : > { %901 = vmax.xlane.f32.xlu2 %v900_v63  ;;  %v778_v1 = vpop.f32.mrf.mxu2 }
 0x1f4   : > { %v779_v2 = vadd.f32 %v778_v1, %v664_v0  ;;  %v827_v4 = vpop.f32.mrf.mxu3 }
 0x1f5   : > { %v828_v5 = vadd.f32 %v827_v4, %v664_v0 }
 0x1f6   : > { %v863_v6 = vmax.f32 %v779_v2, 0.0 }
 0x1f7   : > { %v864_v7 = vmax.f32 %v828_v5, 0.0 }
 0x1f9   : > { %v903_v53 = vmax.f32 %v863_v6, %v864_v7 }
 0x1fb   : > { %904 = vmax.xlane.f32.xlu0 %v903_v53  ;;  %v780_v9 = vpop.f32.mrf.mxu2 }
 0x1fc   : > { %v781_v10 = vadd.f32 %v780_v9, %v669_v8  ;;  %v829_v58 = vpop.f32.mrf.mxu3 }
 0x1fd   : > { %v830_v11 = vadd.f32 %v829_v58, %v669_v8 }
 0x1fe   : > { %v865_v12 = vmax.f32 %v781_v10, 0.0 }
 0x1ff   : > { %v866_v13 = vmax.f32 %v830_v11, 0.0 }
 0x201   : > { %v906_v14 = vmax.f32 %v865_v12, %v866_v13 }
 0x203   : > { %907 = vmax.xlane.f32.xlu1 %v906_v14  ;;  %v783_v18 = vpop.f32.mrf.mxu2 }
 0x204   : > { %v784_v19 = vadd.f32 %v783_v18, %v674_v15  ;;  %v832_v20 = vpop.f32.mrf.mxu3 }
 0x205   : > { %v833_v21 = vadd.f32 %v832_v20, %v674_v15 }
 0x206   : > { %v867_v22 = vmax.f32 %v784_v19, 0.0 }
 0x207   : > { %v868_v23 = vmax.f32 %v833_v21, 0.0 }
 0x209   : > { %v909_v24 = vmax.f32 %v867_v22, %v868_v23 }
 0x20b   : > { %910 = vmax.xlane.f32.xlu2 %v909_v24  ;;  %v785_v28 = vpop.f32.mrf.mxu2 }
 0x20c   : > { %v786_v29 = vadd.f32 %v785_v28, %v679_v27  ;;  %v834_v30 = vpop.f32.mrf.mxu3 }
 0x20d   : > { %v835_v45 = vadd.f32 %v834_v30, %v679_v27 }
 0x20e   : > { %v869_v31 = vmax.f32 %v786_v29, 0.0 }
 0x20f   : > { %v870_v32 = vmax.f32 %v835_v45, 0.0 }
 0x211   : > { %v912_v33 = vmax.f32 %v869_v31, %v870_v32 }
 0x213   : > { %913 = vmax.xlane.f32.xlu0 %v912_v33  ;;  %v788_v35 = vpop.f32.mrf.mxu2 }
 0x214   : > { %v789_v51 = vadd.f32 %v788_v35, %v684_v34  ;;  %v837_v36 = vpop.f32.mrf.mxu3 }
 0x215   : > { %v838_v50 = vadd.f32 %v837_v36, %v684_v34 }
 0x216   : > { %v871_v37 = vmax.f32 %v789_v51, 0.0 }
 0x217   : > { %v872_v46 = vmax.f32 %v838_v50, 0.0 }
 0x219   : > { %v915_v38 = vmax.f32 %v871_v37, %v872_v46 }
 0x21b   : > { %916 = vmax.xlane.f32.xlu1 %v915_v38  ;;  %v790_v42 = vpop.f32.mrf.mxu2 }
 0x21c   : > { %v791_v44 = vadd.f32 %v790_v42, %v689_v41  ;;  %v839_v47 = vpop.f32.mrf.mxu3 }
 0x21d   : > { %v840_v48 = vadd.f32 %v839_v47, %v689_v41 }
 0x21e   : > { %v873_v49 = vmax.f32 %v791_v44, 0.0 }
 0x21f   : > { %v874_v52 = vmax.f32 %v840_v48, 0.0 }
 0x221   : > { %v918_v55 = vmax.f32 %v873_v49, %v874_v52 }
 0x223   : > { %919 = vmax.xlane.f32.xlu2 %v918_v55  ;;  %v793_v43 = vpop.f32.mrf.mxu2 }
 0x224   : > { %v794_v60 = vadd.f32 %v793_v43, %v694_v56  ;;  %v842_v61 = vpop.f32.mrf.mxu3 }
 0x225   : > { %v843_v62 = vadd.f32 %v842_v61, %v694_v56 }
 0x226   : > { %v875_v59 = vmax.f32 %v794_v60, 0.0 }
 0x227   : > { %v876_v3 = vmax.f32 %v843_v62, 0.0 }
 0x229   : > { %v921_v57 = vmax.f32 %v875_v59, %v876_v3 }
 0x22b   : > { %922 = vmax.xlane.f32.xlu0 %v921_v57  ;;  %v795_v39 = vpop.f32.mrf.mxu2 }
 0x22c   : > { %v796_v25 = vadd.f32 %v795_v39, %v699_v54  ;;  %v844_v16 = vpop.f32.mrf.mxu3 }
 0x22d   : > { %v845_v17 = vadd.f32 %v844_v16, %v699_v54 }
 0x22e   : > { %v877_v26 = vmax.f32 %v796_v25, 0.0  ;;  %v881_v40 = vpop.xlane.xlu2 %880 }
 0x22f   : > { %v878_v63 = vmax.f32 %v845_v17, 0.0  ;;  %932 = vst.msk [vmem:[%s1516_s16] sm:$0xff] %vm931_vm1, %v881_v40 }
 0x231   : > { %v924_v0 = vmax.f32 %v877_v26, %v878_v63 }
 0x233   : > { %925 = vmax.xlane.f32.xlu1 %v924_v0 }
 0x236   : > { %v884_v1 = vpop.xlane.xlu0 %883 }
 0x237   : > { %933 = vst.msk [vmem:[%s1516_s16 + $0x8] sm:$0xff] %vm931_vm1, %v884_v1 }
 0x23e   : > { %v887_v2 = vpop.xlane.xlu1 %886 }
 0x23f   : > { %934 = vst.msk [vmem:[%s1516_s16 + $0x10] sm:$0xff] %vm931_vm1, %v887_v2 }
 0x246   : > { %v890_v4 = vpop.xlane.xlu2 %889 }
 0x247   : > { %935 = vst.msk [vmem:[%s1516_s16 + $0x18] sm:$0xff] %vm931_vm1, %v890_v4 }
 0x24e   : > { %v893_v5 = vpop.xlane.xlu2 %892 }
 0x24f   : > { %936 = vst.msk [vmem:[%s1516_s16 + $0x20] sm:$0xff] %vm931_vm1, %v893_v5 }
 0x256   : > { %v896_v6 = vpop.xlane.xlu0 %895 }
 0x257   : > { %937 = vst.msk [vmem:[%s1516_s16 + $0x28] sm:$0xff] %vm931_vm1, %v896_v6 }
 0x25e   : > { %v899_v7 = vpop.xlane.xlu1 %898 }
 0x25f   : > { %938 = vst.msk [vmem:[%s1516_s16 + $0x30] sm:$0xff] %vm931_vm1, %v899_v7 }
 0x266   : > { %v902_v53 = vpop.xlane.xlu2 %901 }
 0x267   : > { %939 = vst.msk [vmem:[%s1516_s16 + $0x38] sm:$0xff] %vm931_vm1, %v902_v53 }
 0x26e   : > { %v905_v8 = vpop.xlane.xlu0 %904 }
 0x26f   : > { %940 = vst.msk [vmem:[%s1516_s16 + $0x40] sm:$0xff] %vm931_vm1, %v905_v8 }
 0x276   : > { %v908_v9 = vpop.xlane.xlu1 %907 }
 0x277   : > { %941 = vst.msk [vmem:[%s1516_s16 + $0x48] sm:$0xff] %vm931_vm1, %v908_v9 }
 0x27e   : > { %v911_v10 = vpop.xlane.xlu2 %910 }
 0x27f   : > { %942 = vst.msk [vmem:[%s1516_s16 + $0x50] sm:$0xff] %vm931_vm1, %v911_v10 }
 0x286   : > { %v914_v58 = vpop.xlane.xlu0 %913 }
 0x287   : > { %943 = vst.msk [vmem:[%s1516_s16 + $0x58] sm:$0xff] %vm931_vm1, %v914_v58 }
 0x28e   : > { %v917_v11 = vpop.xlane.xlu1 %916 }
 0x28f   : > { %944 = vst.msk [vmem:[%s1516_s16 + $0x60] sm:$0xff] %vm931_vm1, %v917_v11 }
 0x296   : > { %v920_v12 = vpop.xlane.xlu2 %919 }
 0x297   : > { %945 = vst.msk [vmem:[%s1516_s16 + $0x68] sm:$0xff] %vm931_vm1, %v920_v12 }
 0x29e   : > { %v923_v13 = vpop.xlane.xlu0 %922 }
 0x29f   : > { %946 = vst.msk [vmem:[%s1516_s16 + $0x70] sm:$0xff] %vm931_vm1, %v923_v13 }
 0x2a6   : > { %v926_v14 = vpop.xlane.xlu1 %925 }
 0x2a7   : > { %947 = vst.msk [vmem:[%s1516_s16 + $0x78] sm:$0xff] %vm931_vm1, %v926_v14 }
 0x2a8 PF: > { %s15_s20 = sadd.s32 1, %s1239_s20   ;;  %s1565_s18 = smov %s1235_s19 }
 0x2a9   : > { %p12_p5 = scmp.ge.s32.totalorder %s15_s20, 4   ;;  %s1566_s19 = smov %s1568_s21 }
 0x2ab   :  { %14 = sbr.rel (!%p12_p5) target bundleno = 2 (0x2), region = 78 }

</bundles_post_ra>
